<compile_context>
chip_gen: v6e
topology: v6e:2x2x1
jax: 0.10.0
libtpu: 0.0.40
codegen_flags: <defaults>
</compile_context>

<pallas_src>
import jax
import jax.numpy as jnp
from jax.experimental import pallas as pl
from jax.experimental.pallas import tpu as pltpu


# --------------------------------------------------------------------------
# Fused kernel:  h = relu(r @ W1r + a @ W1a + b1);  o = h @ W2 + b2
# --------------------------------------------------------------------------
def _predictor_kernel(r_ref, a_ref, w1r_ref, w1a_ref, b1_ref, w2_ref, b2_ref,
                      o_ref):
    # Layer 1, repr part on the MXU (bf16 operands, f32 accumulation).
    h = jnp.dot(r_ref[...].astype(jnp.bfloat16), w1r_ref[...],
                preferred_element_type=jnp.float32)
    # Layer 1, action part: action_dim is tiny (2), so add it with VPU
    # broadcast FMAs instead of a zero-padded MXU matmul.
    a = a_ref[...].astype(jnp.float32)          # (tm, d_act)
    w1a = w1a_ref[...]                          # (d_act, H) f32
    for j in range(a_ref.shape[-1]):            # static unroll, d_act == 2
        h = h + a[:, j:j + 1] * w1a[j:j + 1, :]
    h = jnp.maximum(h + b1_ref[...], 0.0)
    # Layer 2 on the MXU.
    o = jnp.dot(h.astype(jnp.bfloat16), w2_ref[...],
                preferred_element_type=jnp.float32)
    o_ref[...] = (o + b2_ref[...]).astype(o_ref.dtype)


# --------------------------------------------------------------------------
# One-time parameter preparation (hoisted out of the per-call path)
# --------------------------------------------------------------------------
def _round_up(x, m):
    return ((x + m - 1) // m) * m


def prepare_params(params, repr_dim):
    """Split W1 into repr / action parts, cast matmul weights to bf16, and
    reshape biases to (1, dim) f32 rows.  Do this once, not per forward."""
    w1, b1 = params["w1"], params["b1"]          # (repr+act, H), (H,)
    w2, b2 = params["w2"], params["b2"]          # (H, D_out), (D_out,)
    hidden = w1.shape[1]
    d_out = w2.shape[1]
    return {
        "w1r": w1[:repr_dim].astype(jnp.bfloat16),       # (repr_dim, H)
        "w1a": w1[repr_dim:].astype(jnp.float32),        # (d_act, H) tiny
        "b1": b1.reshape(1, hidden).astype(jnp.float32),
        "w2": w2.astype(jnp.bfloat16),                   # (H, D_out)
        "b2": b2.reshape(1, d_out).astype(jnp.float32),
    }


# --------------------------------------------------------------------------
# Forward wrapper
# --------------------------------------------------------------------------
def predictor_forward(prepared, repr_, action, *, tile_m=1024,
                      out_dtype=jnp.bfloat16):
    n, d_repr = repr_.shape
    _, d_act = action.shape
    w1r, w1a = prepared["w1r"], prepared["w1a"]
    b1, w2, b2 = prepared["b1"], prepared["w2"], prepared["b2"]
    hidden = w1r.shape[1]
    d_out = w2.shape[1]
    assert w1r.shape[0] == d_repr and w1a.shape[0] == d_act

    # Batch tiling.  Small batches: block == full array, grid=(1,), no padding
    # or slicing.  Large batches: 16-aligned tile, jnp.pad, slice at the end.
    tile_m = max(16, _round_up(tile_m, 16))
    if n <= tile_m:
        tm, m_pad = n, n
        r_in, a_in = repr_, action
    else:
        tm = tile_m
        m_pad = _round_up(n, tm)
        r_in = jnp.pad(repr_, ((0, m_pad - n), (0, 0)))
        a_in = jnp.pad(action, ((0, m_pad - n), (0, 0)))

    out = pl.pallas_call(
        _predictor_kernel,
        grid=(m_pad // tm,),
        in_specs=[
            pl.BlockSpec((tm, d_repr), lambda i: (i, 0)),       # repr tile
            pl.BlockSpec((tm, d_act), lambda i: (i, 0)),         # action tile
            # Invariant weights / biases (constant index_map -> stay resident).
            pl.BlockSpec((d_repr, hidden), lambda i: (0, 0)),     # W1 repr part
            pl.BlockSpec((d_act, hidden), lambda i: (0, 0)),      # W1 act part
            pl.BlockSpec((1, hidden), lambda i: (0, 0)),          # b1
            pl.BlockSpec((hidden, d_out), lambda i: (0, 0)),      # W2
            pl.BlockSpec((1, d_out), lambda i: (0, 0)),           # b2
        ],
        out_specs=pl.BlockSpec((tm, d_out), lambda i: (i, 0)),
        out_shape=jax.ShapeDtypeStruct((m_pad, d_out), out_dtype),
        compiler_params=pltpu.CompilerParams(
            dimension_semantics=("parallel",)),
    )(r_in, a_in, w1r, w1a, b1, w2, b2)
    # Padded rows (if any) hold relu(b1)@W2+b2 garbage; the slice drops them.
    return out if m_pad == n else out[:n]


# --------------------------------------------------------------------------
# Parameter init (PyTorch nn.Linear default: U(-1/sqrt(fan_in), +1/sqrt(fan_in)))
# and a pure-JAX reference for correctness checking.
# --------------------------------------------------------------------------
def init_params(key, repr_dim=256, action_dim=2):
    k1, k2, k3, k4 = jax.random.split(key, 4)
    in_dim = repr_dim + action_dim
    bound1 = float(1.0 / (in_dim ** 0.5))
    bound2 = float(1.0 / (repr_dim ** 0.5))
    return {
        "w1": jax.random.uniform(k1, (in_dim, repr_dim), jnp.float32,
                                 -bound1, bound1),
        "b1": jax.random.uniform(k2, (repr_dim,), jnp.float32,
                                 -bound1, bound1),
        "w2": jax.random.uniform(k3, (repr_dim, repr_dim), jnp.float32,
                                 -bound2, bound2),
        "b2": jax.random.uniform(k4, (repr_dim,), jnp.float32,
                                 -bound2, bound2),
    }


def predictor_ref(params, repr_, action):
    x = jnp.concatenate([repr_, action], axis=-1)
    h = jnp.maximum(x @ params["w1"] + params["b1"], 0.0)
    return h @ params["w2"] + params["b2"]


if __name__ == "__main__":
    key = jax.random.PRNGKey(0)
    kr, ka, kp = jax.random.split(key, 3)
    # Shapes consistent with the module: batch=2, repr_dim=256, action_dim=2.
    repr_ = jax.random.normal(kr, (2, 256), jnp.float32)
    action = jax.random.normal(ka, (2, 2), jnp.float32)
    params = init_params(kp, repr_dim=256, action_dim=2)

    prepared = prepare_params(params, repr_dim=256)   # one-time weight prep
    out = jax.block_until_ready(predictor_forward(prepared, repr_, action))
    assert out.shape == (2, 256), out.shape
    assert bool(jnp.all(jnp.isfinite(out.astype(jnp.float32))))

    # Correctness vs. pure-JAX f32 reference (loose tolerance: bf16 MXU
    # operands + bf16 output rounding).
    ref = predictor_ref(params, repr_, action)
    max_err = float(jnp.max(jnp.abs(out.astype(jnp.float32) - ref)))
    assert max_err < 8e-2, f"max abs err {max_err}"
    print("KERNEL_OK")
</pallas_src>

<mosaic_0001>
module attributes {stable_mosaic.version = 11 : i64} {
  func.func @_predictor_kernel(%arg0: i32, %arg1: memref<2x256xf32, #tpu.memory_space<vmem>>, %arg2: memref<2x2xf32, #tpu.memory_space<vmem>>, %arg3: memref<256x256xbf16, #tpu.memory_space<vmem>>, %arg4: memref<2x256xf32, #tpu.memory_space<vmem>>, %arg5: memref<1x256xf32, #tpu.memory_space<vmem>>, %arg6: memref<256x256xbf16, #tpu.memory_space<vmem>>, %arg7: memref<1x256xf32, #tpu.memory_space<vmem>>, %arg8: memref<2x256xbf16, #tpu.memory_space<vmem>>) attributes {dimension_semantics = [#tpu.dimension_semantics<parallel>], iteration_bounds = array<i64: 1>, scalar_prefetch = 0 : i64, scratch_operands = 0 : i64, tpu.core_type = #tpu.core_type<tc>, window_params = [{transform_indices = @transform_0, window_bounds = array<i64: 2, 256>}, {transform_indices = @transform_1, window_bounds = array<i64: 2, 2>}, {pipeline_mode = #tpu.pipeline_mode<synchronous>, transform_indices = @transform_2, window_bounds = array<i64: 256, 256>}, {pipeline_mode = #tpu.pipeline_mode<synchronous>, transform_indices = @transform_3, window_bounds = array<i64: 2, 256>}, {pipeline_mode = #tpu.pipeline_mode<synchronous>, transform_indices = @transform_4, window_bounds = array<i64: 1, 256>}, {pipeline_mode = #tpu.pipeline_mode<synchronous>, transform_indices = @transform_5, window_bounds = array<i64: 256, 256>}, {pipeline_mode = #tpu.pipeline_mode<synchronous>, transform_indices = @transform_6, window_bounds = array<i64: 1, 256>}, {transform_indices = @transform_7, window_bounds = array<i64: 2, 256>}]} {
    %c0 = arith.constant 0 : index
    %c0_0 = arith.constant 0 : index
    %0 = vector.load %arg1[%c0, %c0_0] : memref<2x256xf32, #tpu.memory_space<vmem>>, vector<2x256xf32>
    %1 = arith.truncf %0 : vector<2x256xf32> to vector<2x256xbf16>
    %c0_1 = arith.constant 0 : index
    %c0_2 = arith.constant 0 : index
    %2 = vector.load %arg3[%c0_1, %c0_2] : memref<256x256xbf16, #tpu.memory_space<vmem>>, vector<256x256xbf16>
    %cst = arith.constant dense<0.000000e+00> : vector<2x256xf32>
    %3 = tpu.matmul %1, %2, %cst {dimension_numbers = #tpu.dot_dimension_numbers<[1], [0], [0], [1], [0, 0, 1, 1], [], []>} : vector<2x256xbf16>, vector<256x256xbf16>, vector<2x256xf32> -> vector<2x256xf32>
    %c0_3 = arith.constant 0 : index
    %c0_4 = arith.constant 0 : index
    %4 = vector.load %arg2[%c0_3, %c0_4] : memref<2x2xf32, #tpu.memory_space<vmem>>, vector<2x2xf32>
    %c0_5 = arith.constant 0 : index
    %c0_6 = arith.constant 0 : index
    %5 = vector.load %arg4[%c0_5, %c0_6] : memref<2x256xf32, #tpu.memory_space<vmem>>, vector<2x256xf32>
    %6 = vector.extract_strided_slice %4 {offsets = [0, 0], sizes = [2, 1], strides = [1, 1]} : vector<2x2xf32> to vector<2x1xf32>
    %7 = vector.extract_strided_slice %5 {offsets = [0, 0], sizes = [1, 256], strides = [1, 1]} : vector<2x256xf32> to vector<1x256xf32>
    %8 = vector.broadcast %6 : vector<2x1xf32> to vector<2x256xf32>
    %9 = vector.broadcast %7 : vector<1x256xf32> to vector<2x256xf32>
    %10 = arith.mulf %8, %9 : vector<2x256xf32>
    %11 = arith.addf %3, %10 : vector<2x256xf32>
    %12 = vector.extract_strided_slice %4 {offsets = [0, 1], sizes = [2, 1], strides = [1, 1]} : vector<2x2xf32> to vector<2x1xf32>
    %13 = vector.extract_strided_slice %5 {offsets = [1, 0], sizes = [1, 256], strides = [1, 1]} : vector<2x256xf32> to vector<1x256xf32>
    %14 = vector.broadcast %12 : vector<2x1xf32> to vector<2x256xf32>
    %15 = vector.broadcast %13 : vector<1x256xf32> to vector<2x256xf32>
    %16 = arith.mulf %14, %15 : vector<2x256xf32>
    %17 = arith.addf %11, %16 : vector<2x256xf32>
    %c0_7 = arith.constant 0 : index
    %c0_8 = arith.constant 0 : index
    %18 = vector.load %arg5[%c0_7, %c0_8] : memref<1x256xf32, #tpu.memory_space<vmem>>, vector<1x256xf32>
    %19 = vector.broadcast %18 : vector<1x256xf32> to vector<2x256xf32>
    %20 = arith.addf %17, %19 : vector<2x256xf32>
    %cst_9 = arith.constant 0.000000e+00 : f32
    %21 = vector.broadcast %cst_9 : f32 to vector<2x256xf32>
    %22 = arith.maximumf %20, %21 : vector<2x256xf32>
    %23 = arith.truncf %22 : vector<2x256xf32> to vector<2x256xbf16>
    %c0_10 = arith.constant 0 : index
    %c0_11 = arith.constant 0 : index
    %24 = vector.load %arg6[%c0_10, %c0_11] : memref<256x256xbf16, #tpu.memory_space<vmem>>, vector<256x256xbf16>
    %cst_12 = arith.constant dense<0.000000e+00> : vector<2x256xf32>
    %25 = tpu.matmul %23, %24, %cst_12 {dimension_numbers = #tpu.dot_dimension_numbers<[1], [0], [0], [1], [0, 0, 1, 1], [], []>} : vector<2x256xbf16>, vector<256x256xbf16>, vector<2x256xf32> -> vector<2x256xf32>
    %c0_13 = arith.constant 0 : index
    %c0_14 = arith.constant 0 : index
    %26 = vector.load %arg7[%c0_13, %c0_14] : memref<1x256xf32, #tpu.memory_space<vmem>>, vector<1x256xf32>
    %27 = vector.broadcast %26 : vector<1x256xf32> to vector<2x256xf32>
    %28 = arith.addf %25, %27 : vector<2x256xf32>
    %29 = arith.truncf %28 : vector<2x256xf32> to vector<2x256xbf16>
    %c0_15 = arith.constant 0 : index
    %c0_16 = arith.constant 0 : index
    %30 = vector.load %arg8[%c0_15, %c0_16] : memref<2x256xbf16, #tpu.memory_space<vmem>>, vector<2x256xbf16>
    tpu.vector_store %arg8[%c0_15, %c0_16], %29 {strides = array<i32>} : memref<2x256xbf16, #tpu.memory_space<vmem>>, vector<2x256xbf16>,
    return
  }
  func.func @transform_0(%arg0: i32) -> (i32, i32) {
    %c0_i32 = arith.constant 0 : i32
    %c0_i32_0 = arith.constant 0 : i32
    return %arg0, %c0_i32 : i32, i32
  }
  func.func @transform_1(%arg0: i32) -> (i32, i32) {
    %c0_i32 = arith.constant 0 : i32
    %c0_i32_0 = arith.constant 0 : i32
    return %arg0, %c0_i32 : i32, i32
  }
  func.func @transform_2(%arg0: i32) -> (i32, i32) {
    %c0_i32 = arith.constant 0 : i32
    %c0_i32_0 = arith.constant 0 : i32
    %c0_i32_1 = arith.constant 0 : i32
    return %c0_i32, %c0_i32_0 : i32, i32
  }
  func.func @transform_3(%arg0: i32) -> (i32, i32) {
    %c0_i32 = arith.constant 0 : i32
    %c0_i32_0 = arith.constant 0 : i32
    %c0_i32_1 = arith.constant 0 : i32
    return %c0_i32, %c0_i32_0 : i32, i32
  }
  func.func @transform_4(%arg0: i32) -> (i32, i32) {
    %c0_i32 = arith.constant 0 : i32
    %c0_i32_0 = arith.constant 0 : i32
    %c0_i32_1 = arith.constant 0 : i32
    return %c0_i32, %c0_i32_0 : i32, i32
  }
  func.func @transform_5(%arg0: i32) -> (i32, i32) {
    %c0_i32 = arith.constant 0 : i32
    %c0_i32_0 = arith.constant 0 : i32
    %c0_i32_1 = arith.constant 0 : i32
    return %c0_i32, %c0_i32_0 : i32, i32
  }
  func.func @transform_6(%arg0: i32) -> (i32, i32) {
    %c0_i32 = arith.constant 0 : i32
    %c0_i32_0 = arith.constant 0 : i32
    %c0_i32_1 = arith.constant 0 : i32
    return %c0_i32, %c0_i32_0 : i32, i32
  }
  func.func @transform_7(%arg0: i32) -> (i32, i32) {
    %c0_i32 = arith.constant 0 : i32
    %c0_i32_0 = arith.constant 0 : i32
    return %arg0, %c0_i32 : i32, i32
  }
}

</mosaic_0001>

<bundles_post_ra>
// kernel: tpu_custom_call.1
= control target key start
LH: loop header
LB: loop body
LE: loop exit
PB: predicated region body
PF: predicated region fallthrough
CT: control target
= control target key end

     0   :  { %12 = vsyncpa [#allocation3], 0  ;;  %s1043_s0 = inlined_call_operand.hbm [shape: f32[2,256], index: 0, kind: input, shape index: {}]   ;;  %s1044_s1 = inlined_call_operand.hbm [shape: f32[2,2], index: 1, kind: input, shape index: {}]   ;;  %s1045_s2 = inlined_call_operand.hbm [shape: bf16[256,256], index: 2, kind: input, shape index: {}]   ;;  %s1046_s3 = inlined_call_operand.vmem [shape: f32[2,256], index: 3, kind: input, shape index: {}]   ;;  %s1047_s4 = inlined_call_operand.vmem [shape: f32[1,256], index: 4, kind: input, shape index: {}]   ;;  %s1048_s5 = inlined_call_operand.hbm [shape: bf16[256,256], index: 5, kind: input, shape index: {}]   ;;  %s1049_s6 = inlined_call_operand.vmem [shape: f32[1,256], index: 6, kind: input, shape index: {}]   ;;  %s1050_s7 = inlined_call_operand.hbm [shape: bf16[2,256], index: 7, kind: output, shape index: {}]  }
   0x1   :  { %13 = vsyncpa [#allocation6], 0 }
   0x2   :  { %14 = vsyncpa [#allocation9], 0 }
   0x3   :  { %15 = vsyncpa [#allocation4], 0  ;;  %s963_s24 = smov [#allocation5]   ;;  %s964_s26 = smov [#allocation2]  }
   0x4   :  { %s32_s25 = sshll.u32 %s963_s24, 4  ;;  %s22_s27 = sshll.u32 %s964_s26, 4  ;;  %s33_s25 = int_to_ptr.vmem [resolvable:$true] %s32_s25  ;;  %s23_s27 = int_to_ptr.vmem [resolvable:$true] %s22_s27 }
   0x5   :  { %s863_s28 = scalar_lea.vmem %s33_s25, 32  ;;  %p868_p1 = scmp.lt.s32.totalorder %s33_s25, %s33_s25 }
   0x6   :  { %p864_p0 = scmp.ne.s32.totalorder %s33_s25, %s863_s28  ;;  %p869_p2 = scmp.lt.s32.totalorder %s863_s28, %s863_s28 }
   0x8   :  { %p870_p3 = por %p869_p2, %p868_p1 }
   0xa   :  { %p871_p4 = pnand %p870_p3, %p864_p0 }
   0xc   :  { %874 = shalt.err (!%p871_p4)
}
   0xd   :  { %35 = dma.hbm_to_vmem [thread:$0]  %s1044_s1, 32, %s33_s25, [#allocation6]  }
   0xe   :  { %s883_s8 = scalar_lea.vmem %s23_s27, 64  ;;  %p888_p6 = scmp.lt.s32.totalorder %s23_s27, %s23_s27 }
   0xf   :  { %p884_p5 = scmp.ne.s32.totalorder %s23_s27, %s883_s8  ;;  %p889_p7 = scmp.lt.s32.totalorder %s883_s8, %s883_s8 }
  0x11   :  { %p890_p8 = por %p889_p7, %p888_p6 }
  0x13   :  { %p891_p9 = pnand %p890_p8, %p884_p5 }
  0x15   :  { %894 = shalt.err (!%p891_p9)
}
  0x16   :  { %25 = dma.hbm_to_vmem [thread:$0]  %s1043_s0, 64, %s23_s27, [#allocation3]  }
  0x17   :  { %s965_s11 = smov [#allocation7]  }
  0x18   :  { %s41_s12 = sshll.u32 %s965_s11, 4  ;;  %s42_s12 = int_to_ptr.vmem [resolvable:$true] %s41_s12 }
  0x19   :  { %s903_s13 = scalar_lea.vmem %s42_s12, 4096  ;;  %p908_p11 = scmp.lt.s32.totalorder %s42_s12, %s42_s12 }
  0x1a   :  { %p904_p10 = scmp.ne.s32.totalorder %s42_s12, %s903_s13  ;;  %p909_p12 = scmp.lt.s32.totalorder %s903_s13, %s903_s13 }
  0x1c   :  { %p910_p13 = por %p909_p12, %p908_p11 }
  0x1e   :  { %p911_p0 = pnand %p910_p13, %p904_p10 }
  0x20   :  { %914 = shalt.err (!%p911_p0)
}
  0x21   :  { %s966_s1 = smov 128   ;;  %s967_s14 = smov 8  }
  0x22   :  { %47 = dma.hbm_to_vmem [thread:$0]  %s1045_s2, 4096, %s42_s12, [#allocation6], %s966_s1, %s966_s1, %s967_s14  }
  0x23   :  { %s968_s17 = smov [#allocation8]  }
  0x24   :  { %s57_s18 = sshll.u32 %s968_s17, 4  ;;  %s58_s18 = int_to_ptr.vmem [resolvable:$true] %s57_s18 }
  0x25   :  { %s923_s0 = scalar_lea.vmem %s58_s18, 4096  ;;  %p928_p2 = scmp.lt.s32.totalorder %s58_s18, %s58_s18 }
  0x26   :  { %p924_p1 = scmp.ne.s32.totalorder %s58_s18, %s923_s0  ;;  %p929_p3 = scmp.lt.s32.totalorder %s923_s0, %s923_s0 }
  0x28   :  { %p930_p4 = por %p929_p3, %p928_p2 }
  0x2a   :  { %p931_p5 = pnand %p930_p4, %p924_p1 }
  0x2c   :  { %934 = shalt.err (!%p931_p5)
}
  0x2d   :  { %63 = dma.hbm_to_vmem [thread:$0]  %s1048_s5, 4096, %s58_s18, [#allocation9], %s966_s1, %s966_s1, %s967_s14  }
  0x2e   :  { %955 = dma.done.wait [#allocation3], 64  }
  0x2f   :  { %956 = vsyncadd [#allocation3], 4294967232 }
  0x30   :  { %957 = dma.done.wait [#allocation6], 4128  }
  0x31   :  { %958 = vsyncadd [#allocation6], 4294963168 }
  0x32   :  { %959 = dma.done.wait [#allocation9], 4096  }
  0x33   :  { %960 = vsyncadd [#allocation9], 4294963200  ;;  %v969_v0 = vmov 0   ;;  %v759_v1 = vld [vmem:[#allocation7 + $0x74] ss:$8 sps:$4 sm:$0xff]   ;;  %v970_v25 = vmov 1  }
  0x34   :  { %757 = vset.pattern.permute.xlu0 %v969_v0  ;;  %v761_v2 = vld [vmem:[#allocation7 + $0x70] ss:$8 sps:$4 sm:$0xff]   ;;  %312 = vmatprep.subr.bf16.mxu0 %v759_v1  ;;  %v762_v3 = vld [vmem:[#allocation7 + $0x64] ss:$8 sps:$4 sm:$0xff]   ;;  %v764_v4 = vld [vmem:[#allocation7 + $0x60] ss:$8 sps:$4 sm:$0xff]  }
  0x35   :  { %313 = vmatpush1.bf16.msra.mxu0 %v761_v2  ;;  %v765_v5 = vld [vmem:[#allocation7 + $0x54] ss:$8 sps:$4 sm:$0xff]   ;;  %v767_v6 = vld [vmem:[#allocation7 + $0x50] ss:$8 sps:$4 sm:$0xff]   ;;  %v768_v7 = vld [vmem:[#allocation7 + $0x44] ss:$8 sps:$4 sm:$0xff]  }
  0x36   :  { %314 = vmatprep.subr.bf16.mxu0 %v762_v3  ;;  %v770_v8 = vld [vmem:[#allocation7 + $0x40] ss:$8 sps:$4 sm:$0xff]   ;;  %v771_v9 = vld [vmem:[#allocation7 + $0x34] ss:$8 sps:$4 sm:$0xff]   ;;  %v773_v10 = vld [vmem:[#allocation7 + $0x30] ss:$8 sps:$4 sm:$0xff]  }
  0x37   :  { %v774_v11 = vld [vmem:[#allocation7 + $0x24] ss:$8 sps:$4 sm:$0xff]   ;;  %v776_v12 = vld [vmem:[#allocation7 + $0x20] ss:$8 sps:$4 sm:$0xff]   ;;  %v777_v13 = vld [vmem:[#allocation7 + $0x14] ss:$8 sps:$4 sm:$0xff]  }
  0x38   :  { %v779_v14 = vld [vmem:[#allocation7 + $0x10] ss:$8 sps:$4 sm:$0xff]   ;;  %v124_v17 = vld [vmem:[#allocation5] sm:$0x3]  ;;  %v780_v20 = vld [vmem:[#allocation7 + $0x4] ss:$8 sps:$4 sm:$0xff]  }
  0x39   :  { %315 = vmatpush1.bf16.msra.mxu0 %v764_v4  ;;  %v1025_v15 = vld.sshfl [vmem:[#allocation2] sm:$0x33 pattern:$0x76325410]  ;;  %128 = vperm.xlu0 %757, %v124_v17   ;;  %v810_v22 = vld [vmem:[#allocation8 + $0x64] ss:$8 sps:$4 sm:$0xff]  }
  0x3a   :  { %316 = vmatprep.subr.bf16.mxu0 %v765_v5  ;;  %v87_v16 = vcombine.high %v1025_v15, %v1025_v15  ;;  %v807_v18 = vld [vmem:[#allocation8 + $0x74] ss:$8 sps:$4 sm:$0xff]   ;;  %v809_v19 = vld [vmem:[#allocation8 + $0x70] ss:$8 sps:$4 sm:$0xff]   ;;  %v812_v23 = vld [vmem:[#allocation8 + $0x60] ss:$8 sps:$4 sm:$0xff]   ;;  %v90_v59 = vpack.c.bf16 %v1025_v15, %v1025_v15 }
  0x3b   :  { %601 = vmatprep.subr.bf16.mxu1 %v807_v18  ;;  %v782_v24 = vld [vmem:[#allocation7] ss:$8 sps:$4 sm:$0xff]   ;;  %v813_v26 = vld [vmem:[#allocation8 + $0x54] ss:$8 sps:$4 sm:$0xff]   ;;  %v815_v28 = vld [vmem:[#allocation8 + $0x50] ss:$8 sps:$4 sm:$0xff]  }
  0x3c   :  { %v91_v21 = vpack.c.bf16 %v87_v16, %v87_v16  ;;  %602 = vmatpush1.bf16.msra.mxu1 %v809_v19  ;;  %v783_v27 = vld [vmem:[#allocation7 + $0xf4] ss:$8 sps:$4 sm:$0xff]   ;;  %v785_v29 = vld [vmem:[#allocation7 + $0xf0] ss:$8 sps:$4 sm:$0xff]   ;;  %v816_v30 = vld [vmem:[#allocation8 + $0x44] ss:$8 sps:$4 sm:$0xff]  }
  0x3d   :  { %317 = vmatpush1.bf16.msra.mxu0 %v767_v6  ;;  %758 = vset.pattern.permute.xlu0 %v970_v25  ;;  %v786_v31 = vld [vmem:[#allocation7 + $0xe4] ss:$8 sps:$4 sm:$0xff]   ;;  %v818_v32 = vld [vmem:[#allocation8 + $0x40] ss:$8 sps:$4 sm:$0xff]   ;;  %v819_v34 = vld [vmem:[#allocation8 + $0x34] ss:$8 sps:$4 sm:$0xff]  }
  0x3e   :  { %318 = vmatprep.subr.bf16.mxu0 %v768_v7  ;;  %344 = vmatprep.mubr.bf16.mxu0 %v91_v21  ;;  %v788_v33 = vld [vmem:[#allocation7 + $0xe0] ss:$8 sps:$4 sm:$0xff]   ;;  %v789_v35 = vld [vmem:[#allocation7 + $0xd4] ss:$8 sps:$4 sm:$0xff]   ;;  %v791_v36 = vld [vmem:[#allocation7 + $0xd0] ss:$8 sps:$4 sm:$0xff]   ;;  %v132_v7 = vlaneseq }
  0x3f   :  { %354 = vperm.xlu0 %758, %v124_v17   ;;  %603 = vmatprep.subr.bf16.mxu1 %v810_v22  ;;  %v821_v37 = vld [vmem:[#allocation8 + $0x30] ss:$8 sps:$4 sm:$0xff]   ;;  %v792_v38 = vld [vmem:[#allocation7 + $0xc4] ss:$8 sps:$4 sm:$0xff]   ;;  %v824_v40 = vld [vmem:[#allocation8 + $0x20] ss:$8 sps:$4 sm:$0xff]  }
  0x40   :  { %604 = vmatpush1.bf16.msra.mxu1 %v812_v23  ;;  %v822_v39 = vld [vmem:[#allocation8 + $0x24] ss:$8 sps:$4 sm:$0xff]   ;;  %v794_v41 = vld [vmem:[#allocation7 + $0xc0] ss:$8 sps:$4 sm:$0xff]   ;;  %v825_v42 = vld [vmem:[#allocation8 + $0x14] ss:$8 sps:$4 sm:$0xff]  }
  0x41   :  { %319 = vmatpush1.bf16.msra.mxu0 %v770_v8  ;;  %605 = vmatprep.subr.bf16.mxu1 %v813_v26  ;;  %v795_v43 = vld [vmem:[#allocation7 + $0xb4] ss:$8 sps:$4 sm:$0xff]   ;;  %v827_v44 = vld [vmem:[#allocation8 + $0x10] ss:$8 sps:$4 sm:$0xff]   ;;  %v828_v46 = vld [vmem:[#allocation8 + $0x4] ss:$8 sps:$4 sm:$0xff]  }
  0x42   :  { %320 = vmatprep.subr.bf16.mxu0 %v771_v9  ;;  %v797_v45 = vld [vmem:[#allocation7 + $0xb0] ss:$8 sps:$4 sm:$0xff]   ;;  %v798_v47 = vld [vmem:[#allocation7 + $0xa4] ss:$8 sps:$4 sm:$0xff]   ;;  %v830_v48 = vld [vmem:[#allocation8] ss:$8 sps:$4 sm:$0xff]  }
  0x43   :  { %v800_v49 = vld [vmem:[#allocation7 + $0xa0] ss:$8 sps:$4 sm:$0xff]   ;;  %v831_v50 = vld [vmem:[#allocation8 + $0xf4] ss:$8 sps:$4 sm:$0xff]   ;;  %v833_v52 = vld [vmem:[#allocation8 + $0xf0] ss:$8 sps:$4 sm:$0xff]  }
  0x44   :  { %606 = vmatpush1.bf16.msra.mxu1 %v815_v28  ;;  %v801_v51 = vld [vmem:[#allocation7 + $0x94] ss:$8 sps:$4 sm:$0xff]   ;;  %v803_v53 = vld [vmem:[#allocation7 + $0x90] ss:$8 sps:$4 sm:$0xff]   ;;  %v834_v54 = vld [vmem:[#allocation8 + $0xe4] ss:$8 sps:$4 sm:$0xff]  }
  0x45   :  { %321 = vmatpush1.bf16.msra.mxu0 %v773_v10  ;;  %607 = vmatprep.subr.bf16.mxu1 %v816_v30  ;;  %v804_v55 = vld [vmem:[#allocation7 + $0x84] ss:$8 sps:$4 sm:$0xff]   ;;  %v836_v56 = vld [vmem:[#allocation8 + $0xe0] ss:$8 sps:$4 sm:$0xff]   ;;  %v837_v58 = vld [vmem:[#allocation8 + $0xd4] ss:$8 sps:$4 sm:$0xff]  }
  0x46   :  { %322 = vmatprep.subr.bf16.mxu0 %v774_v11  ;;  %v806_v57 = vld [vmem:[#allocation7 + $0x80] ss:$8 sps:$4 sm:$0xff]   ;;  %v839_v60 = vld [vmem:[#allocation8 + $0xd0] ss:$8 sps:$4 sm:$0xff]   ;;  %v840_v61 = vld [vmem:[#allocation8 + $0xc4] ss:$8 sps:$4 sm:$0xff]  }
  0x47   :  { %v842_v62 = vld [vmem:[#allocation8 + $0xc0] ss:$8 sps:$4 sm:$0xff]   ;;  %v843_v63 = vld [vmem:[#allocation8 + $0xb4] ss:$8 sps:$4 sm:$0xff]   ;;  %v845_v0 = vld [vmem:[#allocation8 + $0xb0] ss:$8 sps:$4 sm:$0xff]  }
  0x48   :  { %608 = vmatpush1.bf16.msra.mxu1 %v818_v32  ;;  %v846_v1 = vld [vmem:[#allocation8 + $0xa4] ss:$8 sps:$4 sm:$0xff]   ;;  %v848_v2 = vld [vmem:[#allocation8 + $0xa0] ss:$8 sps:$4 sm:$0xff]   ;;  %v849_v3 = vld [vmem:[#allocation8 + $0x94] ss:$8 sps:$4 sm:$0xff]  }
  0x49   :  { %323 = vmatpush1.bf16.msra.mxu0 %v776_v12  ;;  %609 = vmatprep.subr.bf16.mxu1 %v819_v34  ;;  %v851_v4 = vld [vmem:[#allocation8 + $0x90] ss:$8 sps:$4 sm:$0xff]   ;;  %v852_v5 = vld [vmem:[#allocation8 + $0x84] ss:$8 sps:$4 sm:$0xff]   ;;  %v854_v6 = vld [vmem:[#allocation8 + $0x80] ss:$8 sps:$4 sm:$0xff]  }
  0x4a   :  { %324 = vmatprep.subr.bf16.mxu0 %v777_v13  ;;  %v133_v8 = vshrl.u32 %v132_v7, 7  ;;  %v125_v10 = vld [vmem:[%s1046_s3] sm:$0xf]  ;;  %s972_s23 = smov [#allocation10]  }
  0x4b   :  { %v379_v25 = vld [vmem:[%s1047_s4] sm:$0x3]  ;;  %s669_s24 = sshll.u32 %s972_s23, 4  ;;  %s670_s24 = int_to_ptr.vmem [resolvable:$true] %s669_s24 }
  0x4c   :  { %610 = vmatpush1.bf16.msra.mxu1 %v821_v37  ;;  %v134_v9 = vsub.s32 0, %v133_v8  ;;  %v359_v11 = vsub.s32 1, %v133_v8  ;;  %v138_v13 = vsub.s32 2, %v133_v8  ;;  %s935_s25 = scalar_lea.vmem %s670_s24, 32  ;;  %p940_p7 = scmp.lt.s32.totalorder %s670_s24, %s670_s24 }
  0x4d   :  { %325 = vmatpush1.bf16.msra.mxu0 %v779_v14  ;;  %611 = vmatprep.subr.bf16.mxu1 %v822_v39  ;;  %v363_v14 = vsub.s32 3, %v133_v8  ;;  %p936_p6 = scmp.ne.s32.totalorder %s670_s24, %s935_s25  ;;  %p941_p8 = scmp.lt.s32.totalorder %s935_s25, %s935_s25 }
  0x4e   :  { %326 = vmatprep.subr.bf16.mxu0 %v780_v20  ;;  %v135_v12 = vrot.slane %v125_v10, %v134_v9  ;;  %v360_v16 = vrot.slane %v125_v10, %v359_v11  ;;  %v139_v17 = vrot.slane %v125_v10, %v138_v13 }
  0x4f   :  { %v364_v19 = vrot.slane %v125_v10, %v363_v14  ;;  %p942_p9 = por %p941_p8, %p940_p7 }
  0x50   :  { %612 = vmatpush1.bf16.msra.mxu1 %v824_v40  ;;  %v145_v18 = vrot.slane %v135_v12, %v134_v9  ;;  %v370_v20 = vrot.slane %v360_v16, %v359_v11  ;;  %v149_v22 = vrot.slane %v139_v17, %v134_v9 }
  0x51   :  { %327 = vmatpush1.bf16.msra.mxu0 %v782_v24  ;;  %613 = vmatprep.subr.bf16.mxu1 %v825_v42  ;;  %v374_v24 = vrot.slane %v364_v19, %v359_v11  ;;  %p943_p10 = pnand %p942_p9, %p936_p6 }
  0x52   :  { %328 = vmatprep.subr.bf16.mxu0 %v783_v27 }
  0x54   :  { %614 = vmatpush1.bf16.msra.mxu1 %v827_v44 }
  0x55   :  { %329 = vmatpush2.bf16.msra.mxu0 %v785_v29  ;;  %615 = vmatprep.subr.bf16.mxu1 %v828_v46 }
  0x56   :  { %330 = vmatprep.subr.bf16.mxu0 %v786_v31  ;;  %v384_v31 = vrot.slane %v379_v25, %v134_v9 }
  0x58   :  { %616 = vmatpush1.bf16.msra.mxu1 %v830_v48 }
  0x59   :  { %331 = vmatpush2.bf16.msra.mxu0 %v788_v33  ;;  %617 = vmatprep.subr.bf16.mxu1 %v831_v50 }
  0x5a   :  { %332 = vmatprep.subr.bf16.mxu0 %v789_v35  ;;  %v388_v35 = vrot.slane %v379_v25, %v359_v11 }
  0x5c   :  { %618 = vmatpush2.bf16.msra.mxu1 %v833_v52 }
  0x5d   :  { %333 = vmatpush2.bf16.msra.mxu0 %v791_v36  ;;  %619 = vmatprep.subr.bf16.mxu1 %v834_v54 }
  0x5e   :  { %334 = vmatprep.subr.bf16.mxu0 %v792_v38 }
  0x60   :  { %620 = vmatpush2.bf16.msra.mxu1 %v836_v56 }
  0x61   :  { %335 = vmatpush2.bf16.msra.mxu0 %v794_v41  ;;  %621 = vmatprep.subr.bf16.mxu1 %v837_v58 }
  0x62   :  { %336 = vmatprep.subr.bf16.mxu0 %v795_v43 }
  0x64   :  { %622 = vmatpush2.bf16.msra.mxu1 %v839_v60 }
  0x65   :  { %337 = vmatpush2.bf16.msra.mxu0 %v797_v45  ;;  %623 = vmatprep.subr.bf16.mxu1 %v840_v61  ;;  %v971_v45 = vmov 1966171168  }
  0x66   :  { %338 = vmatprep.subr.bf16.mxu0 %v798_v47  ;;  %v648_v46 = vunpack.c.l.s4 %v971_v45  ;;  %v429_v47 = vld [vmem:[%s1049_s6] sm:$0x3] }
  0x67   :  { %v434_v48 = vrot.slane %v429_v47, %v134_v9 }
  0x68   :  { %624 = vmatpush2.bf16.msra.mxu1 %v842_v62  ;;  %v649_v50 = vunpack.c.0.s8 %v648_v46 }
  0x69   :  { %339 = vmatpush2.bf16.msra.mxu0 %v800_v49  ;;  %625 = vmatprep.subr.bf16.mxu1 %v843_v63  ;;  %v438_v49 = vrot.slane %v429_v47, %v359_v11 }
  0x6a   :  { %340 = vmatprep.subr.bf16.mxu0 %v801_v51 }
  0x6c   :  { %626 = vmatpush2.bf16.msra.mxu1 %v845_v0 }
  0x6d   :  { %341 = vmatpush2.bf16.msra.mxu0 %v803_v53  ;;  %627 = vmatprep.subr.bf16.mxu1 %v846_v1 }
  0x6e   :  { %342 = vmatprep.subr.bf16.mxu0 %v804_v55  ;;  %v652_v55 = vsub.s32 %v649_v50, %v133_v8 }
  0x70   :  { %628 = vmatpush2.bf16.msra.mxu1 %v848_v2 }
  0x71   :  { %343 = vmatpush2.bf16.msra.mxu0 %v806_v57  ;;  %629 = vmatprep.subr.bf16.mxu1 %v849_v3 }
  0x74   :  { %345 = vmatmul.mubr.bf16.vlgmr.msra.gmra.mxu0 %v90_v59  ;;  %630 = vmatpush2.bf16.msra.mxu1 %v851_v4 }
  0x75   :  { %631 = vmatprep.subr.bf16.mxu1 %v852_v5 }
  0x78   :  { %632 = vmatpush2.bf16.msra.mxu1 %v854_v6 }
  0xb4   :  { %v129_v15 = vpop.permute.xlu0 %128 }
  0xb5   :  { %v150_v23 = vmul.f32 %v145_v18, %v129_v15  ;;  %v151_v28 = vmul.f32 %v149_v22, %v129_v15 }
  0xba   :  { %v355_v21 = vpop.permute.xlu0 %354 }
  0xbb   :  { %v375_v26 = vmul.f32 %v370_v20, %v355_v21  ;;  %v376_v29 = vmul.f32 %v374_v24, %v355_v21 }
 0x134   :  { %v346_v27 = vpop.f32.mrf.mxu0 }
 0x135   :  { %v347_v30 = vadd.f32 %v346_v27, %v150_v23 }
 0x136   :  { %v348_v32 = vpop.f32.mrf.mxu0 }
 0x137   :  { %v377_v33 = vadd.f32 %v375_v26, %v347_v30  ;;  %v349_v34 = vadd.f32 %v348_v32, %v151_v28 }
 0x138   :  { %v350_v36 = vpop.f32.mrf.mxu0 }
 0x139   :  { %v378_v37 = vadd.f32 %v376_v29, %v349_v34  ;;  %v391_v38 = vadd.f32 %v384_v31, %v377_v33 }
 0x13a   :  { %v351_v39 = vpop.f32.mrf.mxu0 }
 0x13b   :  { %v392_v40 = vadd.f32 %v388_v35, %v378_v37  ;;  %v393_v41 = vmax.f32 %v391_v38, 0.0 }
 0x13d   :  { %v394_v42 = vmax.f32 %v392_v40, 0.0  ;;  %v395_v44 = vpack.c.bf16 %v393_v41, %v393_v41 }
 0x13f   :  { %v396_v43 = vpack.c.bf16 %v394_v42, %v394_v42 }
 0x141   :  { %633 = vmatprep.mubr.bf16.mxu1 %v396_v43 }
 0x142   :  { %634 = vmatmul.mubr.bf16.vlgmr.msra.gmra.mxu1 %v395_v44 }
 0x202   :  { %v635_v51 = vpop.f32.mrf.mxu1 }
 0x203   :  { %v636_v53 = vadd.f32 %v635_v51, %v434_v48 }
 0x204   :  { %v637_v52 = vpop.f32.mrf.mxu1 }
 0x205   :  { %v638_v54 = vadd.f32 %v637_v52, %v438_v49 }
 0x206   :  { %v639_v56 = vpop.f32.mrf.mxu1 }
 0x207   :  { %v745_v57 = vpack.c.bf16 %v638_v54, %v636_v53 }
 0x208   :  { %v640_v58 = vpop.f32.mrf.mxu1 }
 0x209   :  { %v653_v59 = vrot.slane %v745_v57, %v652_v55 }
 0x20b   :  { %746 = vst.sshfl [vmem:[#allocation10] sm:$0x5 pattern:$0x73625140] %v653_v59 }
 0x20c   :  { %946 = shalt.err (!%p943_p10)
}
 0x20d   :  { %672 = dma.vmem_to_hbm [thread:$0]  %s670_s24, 32, %s1050_s7, [#allocation4]  }
 0x20e   :  { %961 = dma.done.wait [#allocation4], 32  }
 0x20f   :  { %962 = vsyncadd [#allocation4], 4294967264 }
 0x210   :  { %676 = vsyncpa [#allocation3], 1 }
 0x211   :  { %677 = vsyncpa [#allocation6], 1 }
 0x212   :  { %678 = vsyncpa [#allocation9], 1 }
 0x213   :  { %679 = vsyncpa [#allocation4], 1 }

</bundles_post_ra>
